<compile_context>
chip_gen: v7x
topology: tpu7x:2x2x1
jax: 0.10.0
libtpu: 0.0.40
codegen_flags: <defaults>
</compile_context>

<pallas_src>
import functools

import jax
import jax.numpy as jnp
from jax import lax
from jax.experimental import pallas as pl
from jax.experimental.pallas import tpu as pltpu

_LANE_WIDTH = 512          # 4 * 128 lanes -> fully populated vregs
_PALLAS_MIN_ELEMS = 32768  # below this, plain jnp wins (kept low so the demo
                           # exercises the kernel; production might use ~1M)


def _cdiv(a, b):
    return -(-a // b)


def _round_up(x, m):
    return _cdiv(x, m) * m


def _device_config():
    """Generation-aware tiling parameters (safe defaults if unknown)."""
    kind = ""
    try:
        kind = jax.devices()[0].device_kind.lower()
    except Exception:  # pragma: no cover - defensive
        pass
    if "v7" in kind or "7x" in kind:
        # 2 TCs, 64 MiB VMEM/TC, ~3.2 TB/s HBM.
        return dict(max_tile_rows=2048, n_splits=2, vmem_bytes=48 * 2**20)
    if "v6" in kind:
        # 1 TC, 128 MiB VMEM, ~1.4 TB/s HBM.
        return dict(max_tile_rows=4096, n_splits=1, vmem_bytes=64 * 2**20)
    if "v5" in kind:
        # 1 TC, scoped-VMEM default only 16 MiB -> keep moderate tiles.
        return dict(max_tile_rows=1024, n_splits=1, vmem_bytes=32 * 2**20)
    # Unknown generation: conservative settings that fit every chip.
    return dict(max_tile_rows=2048, n_splits=1, vmem_bytes=48 * 2**20)


def _make_sse_kernel(rows, tile_rows, tiles_per_split, needs_mask, lane):
    """SSE kernel: acc += sum((p - t)^2) over the inner (reduction) axis."""

    def kernel(p_ref, t_ref, o_ref, acc_ref):
        split = pl.program_id(0)
        step = pl.program_id(1)

        @pl.when(step == 0)
        def _():
            acc_ref[...] = jnp.zeros_like(acc_ref)

        # Widen to f32 BEFORE the subtract (bf16-safe; free on the VPU).
        d = p_ref[...].astype(jnp.float32) - t_ref[...].astype(jnp.float32)
        dd = d * d

        if needs_mask:
            # Ragged tail / phantom tiles: zero out logical rows >= rows.
            gtile = split * tiles_per_split + step
            row0 = gtile * tile_rows
            rid = row0 + lax.broadcasted_iota(jnp.int32, dd.shape, 0)
            dd = jnp.where(rid < rows, dd, 0.0)

        # Lane-dense partial reduction: collapse row-groups of 8 with pure
        # VPU vreg adds; keep the XLU cross-lane reduce out of steady state.
        acc_ref[...] += jnp.sum(dd.reshape(tile_rows // 8, 8, lane), axis=0)

        @pl.when(step == pl.num_programs(1) - 1)
        def _():
            # One cross-lane reduce + one unmasked lane-dense (8,128) store.
            o_ref[...] = jnp.broadcast_to(jnp.sum(acc_ref[...]), o_ref.shape)

    return kernel


def _pair_mse(pred, true, cfg=None):
    """mean((pred - true)^2); Pallas SSE kernel for large pairs, jnp otherwise."""
    n = int(pred.size)
    if n == 0:
        return jnp.float32(0.0)  # numel()==0 branch of the PyTorch module
    if n < _PALLAS_MIN_ELEMS:
        d = pred.astype(jnp.float32) - true.astype(jnp.float32)
        return jnp.mean(d * d)

    if cfg is None:
        cfg = _device_config()

    p = pred.reshape(-1)
    t = true.reshape(-1)

    rows = n // _LANE_WIDTH
    rem = n - rows * _LANE_WIDTH

    # Sublane packing: 8 (f32), 16 (bf16), 32 (int8/fp8).
    itemsize = min(p.dtype.itemsize, t.dtype.itemsize)
    pack = max(8, 8 * (4 // max(1, itemsize)))

    n_splits = cfg["n_splits"]
    tile_rows = min(cfg["max_tile_rows"],
                    _round_up(_cdiv(rows, n_splits), pack))
    total_tiles = _cdiv(rows, tile_rows)
    n_splits = min(n_splits, total_tiles)
    tiles_per_split = _cdiv(total_tiles, n_splits)
    last_tile = total_tiles - 1
    needs_mask = (rows % tile_rows != 0) or (
        n_splits * tiles_per_split != total_tiles)

    # Aligned body (no pad!); a < 512-element remainder is reduced with jnp.
    if rem:
        body_p = lax.slice(p, (0,), (rows * _LANE_WIDTH,))
        body_t = lax.slice(t, (0,), (rows * _LANE_WIDTH,))
    else:
        body_p, body_t = p, t
    body_p = body_p.reshape(rows, _LANE_WIDTH)
    body_t = body_t.reshape(rows, _LANE_WIDTH)

    def in_map(c, i):
        # Clamp phantom tiles (from the split round-up) so DMAs stay in
        # bounds; their contribution is zeroed by the in-kernel row mask.
        return (jnp.minimum(c * tiles_per_split + i, last_tile), 0)

    in_spec = pl.BlockSpec((tile_rows, _LANE_WIDTH), in_map)
    out_spec = pl.BlockSpec((8, 128), lambda c, i: (c, 0))

    kernel = _make_sse_kernel(rows, tile_rows, tiles_per_split, needs_mask,
                              _LANE_WIDTH)

    cost = pl.CostEstimate(
        flops=3 * rows * _LANE_WIDTH,   # sub + mul + add per element
        transcendentals=0,
        bytes_accessed=(rows * _LANE_WIDTH
                        * (p.dtype.itemsize + t.dtype.itemsize)
                        + n_splits * 8 * 128 * 4),
    )

    out = pl.pallas_call(
        kernel,
        out_shape=jax.ShapeDtypeStruct((n_splits * 8, 128), jnp.float32),
        grid_spec=pltpu.PrefetchScalarGridSpec(
            num_scalar_prefetch=0,
            grid=(n_splits, tiles_per_split),
            in_specs=[in_spec, in_spec],
            out_specs=out_spec,
            scratch_shapes=[pltpu.VMEM((8, _LANE_WIDTH), jnp.float32)],
        ),
        compiler_params=pltpu.CompilerParams(
            dimension_semantics=("parallel", "arbitrary"),
            vmem_limit_bytes=cfg["vmem_bytes"],
        ),
        cost_estimate=cost,
    )(body_p, body_t)

    sse = jnp.sum(out.reshape(n_splits, 8, 128)[:, 0, 0])

    if rem:
        tp = lax.slice(p, (rows * _LANE_WIDTH,), (n,)).astype(jnp.float32)
        tt = lax.slice(t, (rows * _LANE_WIDTH,), (n,)).astype(jnp.float32)
        sse = sse + jnp.sum((tp - tt) ** 2)

    return sse * jnp.float32(1.0 / n)


def train_loss(masked_pred_epsX, masked_pred_epsE, pred_y,
               true_epsX, true_epsE, true_y):
    """Equivalent of TrainLoss.forward(..., log=False) -> scalar MSE sum."""
    # TODO(synk): torchmetrics running state (compute()/reset(), epoch logging,
    # wandb) is host-side bookkeeping with no Pallas equivalent; only the
    # forward-pass loss value is computed here.
    cfg = _device_config()
    mse_x = _pair_mse(masked_pred_epsX, true_epsX, cfg)
    mse_e = _pair_mse(masked_pred_epsE, true_epsE, cfg)
    mse_y = _pair_mse(pred_y, true_y, cfg)
    return mse_x + mse_e + mse_y


if __name__ == "__main__":
    key = jax.random.PRNGKey(0)
    k = jax.random.split(key, 8)

    # Small graph-diffusion-style shapes.  E (2*40*40*16 = 51200 elements)
    # exceeds _PALLAS_MIN_ELEMS, so it exercises the Pallas SSE kernel; the
    # tiny X / y pairs take the fused-jnp fast path.
    bs, n_nodes, dx, de, dy = 2, 40, 16, 16, 32
    pred_X = jax.random.normal(k[0], (bs, n_nodes, dx), dtype=jnp.float32)
    true_X = jax.random.normal(k[1], (bs, n_nodes, dx), dtype=jnp.float32)
    pred_E = jax.random.normal(k[2], (bs, n_nodes, n_nodes, de), dtype=jnp.float32)
    true_E = jax.random.normal(k[3], (bs, n_nodes, n_nodes, de), dtype=jnp.float32)
    pred_y = jax.random.normal(k[4], (bs, dy), dtype=jnp.float32)
    true_y = jax.random.normal(k[5], (bs, dy), dtype=jnp.float32)

    loss_fn = jax.jit(train_loss)
    loss = jax.block_until_ready(
        loss_fn(pred_X, pred_E, pred_y, true_X, true_E, true_y))

    ref = (jnp.mean((pred_X - true_X) ** 2)
           + jnp.mean((pred_E - true_E) ** 2)
           + jnp.mean((pred_y - true_y) ** 2))
    assert jnp.allclose(loss, ref, rtol=1e-5, atol=1e-5), (loss, ref)

    # Extra check: a flat pair whose size is NOT a multiple of 512, to
    # exercise the ragged-tail (jnp remainder) and in-kernel row-mask paths.
    m = 70000
    a = jax.random.normal(k[6], (m,), dtype=jnp.float32)
    b = jax.random.normal(k[7], (m,), dtype=jnp.float32)
    mse_ab = jax.block_until_ready(jax.jit(_pair_mse)(a, b))
    ref_ab = jnp.mean((a - b) ** 2)
    assert jnp.allclose(mse_ab, ref_ab, rtol=1e-5, atol=1e-5), (mse_ab, ref_ab)

    print("KERNEL_OK")
</pallas_src>

<mosaic_0001>
module attributes {stable_mosaic.version = 11 : i64} {
  func.func @kernel(%arg0: i32, %arg1: i32, %arg2: memref<104x512xf32, #tpu.memory_space<vmem>>, %arg3: memref<104x512xf32, #tpu.memory_space<vmem>>, %arg4: memref<8x128xf32, #tpu.memory_space<vmem>>, %arg5: memref<8x512xf32, #tpu.memory_space<vmem>>) attributes {dimension_semantics = [#tpu.dimension_semantics<parallel>, #tpu.dimension_semantics<arbitrary>], iteration_bounds = array<i64: 1, 1>, scalar_prefetch = 0 : i64, scratch_operands = 1 : i64, tpu.core_type = #tpu.core_type<tc>, window_params = [{transform_indices = @transform_0, window_bounds = array<i64: 104, 512>}, {transform_indices = @transform_1, window_bounds = array<i64: 104, 512>}, {transform_indices = @transform_2, window_bounds = array<i64: 8, 128>}]} {
    %c0_i32 = arith.constant 0 : i32
    %0 = arith.cmpi eq, %arg1, %c0_i32 : i32
    %1 = arith.extui %0 : i1 to i32
    %c0_i32_0 = arith.constant 0 : i32
    %2 = arith.cmpi ne, %1, %c0_i32_0 : i32
    scf.if %2 {
      %cst_11 = arith.constant 0.000000e+00 : f32
      %25 = vector.broadcast %cst_11 : f32 to vector<8x512xf32>
      %c0_12 = arith.constant 0 : index
      %c0_13 = arith.constant 0 : index
      %26 = vector.load %arg5[%c0_12, %c0_13] : memref<8x512xf32, #tpu.memory_space<vmem>>, vector<8x512xf32>
      tpu.vector_store %arg5[%c0_12, %c0_13], %25 {strides = array<i32>} : memref<8x512xf32, #tpu.memory_space<vmem>>, vector<8x512xf32>,
    } else {
    }
    %c0 = arith.constant 0 : index
    %c0_1 = arith.constant 0 : index
    %3 = vector.load %arg2[%c0, %c0_1] : memref<104x512xf32, #tpu.memory_space<vmem>>, vector<104x512xf32>
    %c0_2 = arith.constant 0 : index
    %c0_3 = arith.constant 0 : index
    %4 = vector.load %arg3[%c0_2, %c0_3] : memref<104x512xf32, #tpu.memory_space<vmem>>, vector<104x512xf32>
    %5 = arith.subf %3, %4 : vector<104x512xf32>
    %6 = arith.mulf %5, %5 : vector<104x512xf32>
    %c1_i32 = arith.constant 1 : i32
    %7 = arith.muli %arg0, %c1_i32 : i32
    %8 = arith.addi %7, %arg1 : i32
    %c104_i32 = arith.constant 104 : i32
    %9 = arith.muli %8, %c104_i32 : i32
    %10 = tpu.iota {dimensions = array<i32: 0>} : vector<104x512xi32>
    %11 = vector.broadcast %9 : i32 to vector<104x512xi32>
    %12 = arith.addi %11, %10 : vector<104x512xi32>
    %c100_i32 = arith.constant 100 : i32
    %13 = vector.broadcast %c100_i32 : i32 to vector<104x512xi32>
    %14 = arith.cmpi slt, %12, %13 : vector<104x512xi32>
    %cst = arith.constant 0.000000e+00 : f32
    %15 = vector.broadcast %cst : f32 to vector<104x512xf32>
    %16 = arith.select %14, %6, %15 : vector<104x512xi1>, vector<104x512xf32>
    %c0_4 = arith.constant 0 : index
    %c0_5 = arith.constant 0 : index
    %17 = vector.load %arg5[%c0_4, %c0_5] : memref<8x512xf32, #tpu.memory_space<vmem>>, vector<8x512xf32>
    %18 = vector.shape_cast %16 : vector<104x512xf32> to vector<13x8x512xf32>
    %cst_6 = arith.constant dense<0.000000e+00> : vector<8x512xf32>
    %19 = vector.multi_reduction <add>, %18, %cst_6 [0] : vector<13x8x512xf32> to vector<8x512xf32>
    %20 = arith.addf %17, %19 : vector<8x512xf32>
    %c0_7 = arith.constant 0 : index
    %c0_8 = arith.constant 0 : index
    %21 = vector.load %arg5[%c0_7, %c0_8] : memref<8x512xf32, #tpu.memory_space<vmem>>, vector<8x512xf32>
    tpu.vector_store %arg5[%c0_7, %c0_8], %20 {strides = array<i32>} : memref<8x512xf32, #tpu.memory_space<vmem>>, vector<8x512xf32>,
    %c0_i32_9 = arith.constant 0 : i32
    %22 = arith.cmpi eq, %arg1, %c0_i32_9 : i32
    %23 = arith.extui %22 : i1 to i32
    %c0_i32_10 = arith.constant 0 : i32
    %24 = arith.cmpi ne, %23, %c0_i32_10 : i32
    scf.if %24 {
      %c0_11 = arith.constant 0 : index
      %c0_12 = arith.constant 0 : index
      %25 = vector.load %arg5[%c0_11, %c0_12] : memref<8x512xf32, #tpu.memory_space<vmem>>, vector<8x512xf32>
      %26 = vector.shape_cast %25 : vector<8x512xf32> to vector<1x8x512xf32>
      %cst_13 = arith.constant dense<0.000000e+00> : vector<1xf32>
      %27 = vector.multi_reduction <add>, %26, %cst_13 [1, 2] : vector<1x8x512xf32> to vector<1xf32>
      %28 = vector.shape_cast %27 : vector<1xf32> to vector<1x1x1xf32>
      %29 = vector.extract %28[0, 0, 0] : f32 from vector<1x1x1xf32>
      %30 = vector.broadcast %29 : f32 to vector<8x128xf32>
      %c0_14 = arith.constant 0 : index
      %c0_15 = arith.constant 0 : index
      %31 = vector.load %arg4[%c0_14, %c0_15] : memref<8x128xf32, #tpu.memory_space<vmem>>, vector<8x128xf32>
      tpu.vector_store %arg4[%c0_14, %c0_15], %30 {strides = array<i32>} : memref<8x128xf32, #tpu.memory_space<vmem>>, vector<8x128xf32>,
    } else {
    }
    return
  }
  func.func @transform_0(%arg0: i32, %arg1: i32) -> (i32, i32) {
    %c1_i32 = arith.constant 1 : i32
    %0 = arith.muli %arg0, %c1_i32 : i32
    %1 = arith.addi %0, %arg1 : i32
    %c0_i32 = arith.constant 0 : i32
    %2 = arith.minsi %1, %c0_i32 : i32
    %c0_i32_0 = arith.constant 0 : i32
    %c0_i32_1 = arith.constant 0 : i32
    return %2, %c0_i32_0 : i32, i32
  }
  func.func @transform_1(%arg0: i32, %arg1: i32) -> (i32, i32) {
    %c1_i32 = arith.constant 1 : i32
    %0 = arith.muli %arg0, %c1_i32 : i32
    %1 = arith.addi %0, %arg1 : i32
    %c0_i32 = arith.constant 0 : i32
    %2 = arith.minsi %1, %c0_i32 : i32
    %c0_i32_0 = arith.constant 0 : i32
    %c0_i32_1 = arith.constant 0 : i32
    return %2, %c0_i32_0 : i32, i32
  }
  func.func @transform_2(%arg0: i32, %arg1: i32) -> (i32, i32) {
    %c0_i32 = arith.constant 0 : i32
    %c0_i32_0 = arith.constant 0 : i32
    return %arg0, %c0_i32 : i32, i32
  }
}

</mosaic_0001>

<bundles_post_ra>
// kernel: train_loss.1
= control target key start
LH: loop header
LB: loop body
LE: loop exit
PB: predicated region body
PF: predicated region fallthrough
CT: control target
= control target key end

     0   :  { %v299_v0 = vlaneseq  ;;  %s1037_s0 = inlined_call_operand.vmem [shape: f32[100,512], index: 0, kind: input, shape index: {}]   ;;  %s1038_s1 = inlined_call_operand.vmem [shape: f32[100,512], index: 1, kind: input, shape index: {}]   ;;  %s1039_s2 = inlined_call_operand.vmem [shape: f32[8,128], index: 2, kind: output, shape index: {}]  }
   0x1   :  { %v89_v1 = vld [vmem:[%s1037_s0] sm:$0xff]  ;;  %v90_v2 = vld [vmem:[%s1037_s0 + $0x8] sm:$0xff]  ;;  %v91_v3 = vld [vmem:[%s1037_s0 + $0x10] sm:$0xff] }
   0x2   :  { %v141_v4 = vld [vmem:[%s1038_s1] sm:$0xff]  ;;  %v92_v5 = vld [vmem:[%s1037_s0 + $0x18] sm:$0xff]  ;;  %v94_v7 = vld [vmem:[%s1037_s0 + $0x28] sm:$0xff]  ;;  %v300_v10 = vshrl.u32 %v299_v0, 7 }
   0x3   :  { %v93_v6 = vld [vmem:[%s1037_s0 + $0x20] sm:$0xff]  ;;  %v95_v8 = vld [vmem:[%s1037_s0 + $0x30] sm:$0xff]  ;;  %v142_v9 = vld [vmem:[%s1038_s1 + $0x8] sm:$0xff]  ;;  %v193_v22 = vsub.f32 %v89_v1, %v141_v4 }
   0x4   :  { %v96_v11 = vld [vmem:[%s1037_s0 + $0x38] sm:$0xff]  ;;  %v97_v12 = vld [vmem:[%s1037_s0 + $0x40] sm:$0xff]  ;;  %v98_v13 = vld [vmem:[%s1037_s0 + $0x48] sm:$0xff]  ;;  %v194_v29 = vsub.f32 %v90_v2, %v142_v9  ;;  %v602_v37 = vadd.s32 96, %v300_v10 }
   0x5   :  { %v143_v14 = vld [vmem:[%s1038_s1 + $0x10] sm:$0xff]  ;;  %v144_v15 = vld [vmem:[%s1038_s1 + $0x18] sm:$0xff]  ;;  %v101_v18 = vld [vmem:[%s1037_s0 + $0x60] sm:$0xff]  ;;  %v648_v57 = vmul.f32 %v193_v22, %v193_v22 }
   0x6   :  { %v99_v16 = vld [vmem:[%s1037_s0 + $0x50] sm:$0xff]  ;;  %v100_v17 = vld [vmem:[%s1037_s0 + $0x58] sm:$0xff]  ;;  %v145_v19 = vld [vmem:[%s1038_s1 + $0x20] sm:$0xff]  ;;  %v195_v36 = vsub.f32 %v91_v3, %v143_v14  ;;  %1041 = vst [vmem:[#allocation3_spill] sm:$0xff] %v602_v37  ;;  %v196_v44 = vsub.f32 %v92_v5, %v144_v15  ;;  %v674_v3 = vmul.f32 %v194_v29, %v194_v29 }
   0x7   :  { %v146_v20 = vld [vmem:[%s1038_s1 + $0x28] sm:$0xff]  ;;  %v147_v21 = vld [vmem:[%s1038_s1 + $0x30] sm:$0xff]  ;;  %v104_v25 = vld [vmem:[%s1037_s0 + $0x78] sm:$0xff]  ;;  %v197_v45 = vsub.f32 %v93_v6, %v145_v19 }
   0x8   :  { %v102_v23 = vld [vmem:[%s1037_s0 + $0x68] sm:$0xff]  ;;  %v103_v24 = vld [vmem:[%s1037_s0 + $0x70] sm:$0xff]  ;;  %v148_v26 = vld [vmem:[%s1038_s1 + $0x38] sm:$0xff]  ;;  %v198_v46 = vsub.f32 %v94_v7, %v146_v20  ;;  %v622_v47 = vsub.f32 %v95_v8, %v147_v21 }
   0x9   :  { %v149_v27 = vld [vmem:[%s1038_s1 + $0x40] sm:$0xff]  ;;  %v150_v28 = vld [vmem:[%s1038_s1 + $0x48] sm:$0xff]  ;;  %v107_v32 = vld [vmem:[%s1037_s0 + $0x90] sm:$0xff]  ;;  %v642_v54 = vsub.f32 %v96_v11, %v148_v26 }
   0xa   :  { %v105_v30 = vld [vmem:[%s1037_s0 + $0x80] sm:$0xff]  ;;  %v106_v31 = vld [vmem:[%s1037_s0 + $0x88] sm:$0xff]  ;;  %v151_v33 = vld [vmem:[%s1038_s1 + $0x50] sm:$0xff]  ;;  %v644_v55 = vsub.f32 %v97_v12, %v149_v27  ;;  %v646_v56 = vsub.f32 %v98_v13, %v150_v28  ;;  %v700_v13 = vmul.f32 %v195_v36, %v195_v36 }
   0xb   :  { %v152_v34 = vld [vmem:[%s1038_s1 + $0x58] sm:$0xff]  ;;  %v153_v35 = vld [vmem:[%s1038_s1 + $0x60] sm:$0xff]  ;;  %v110_v40 = vld [vmem:[%s1037_s0 + $0xa8] sm:$0xff]  ;;  %v668_v0 = vsub.f32 %v99_v16, %v151_v33  ;;  %v752_v33 = vmul.f32 %v197_v45, %v197_v45 }
   0xc   :  { %v108_v38 = vld [vmem:[%s1037_s0 + $0x98] sm:$0xff]  ;;  %v109_v39 = vld [vmem:[%s1037_s0 + $0xa0] sm:$0xff]  ;;  %v154_v41 = vld [vmem:[%s1038_s1 + $0x68] sm:$0xff]  ;;  %v670_v1 = vsub.f32 %v100_v17, %v152_v34  ;;  %v672_v2 = vsub.f32 %v101_v18, %v153_v35 }
   0xd   :  { %v155_v42 = vld [vmem:[%s1038_s1 + $0x70] sm:$0xff]  ;;  %v156_v43 = vld [vmem:[%s1038_s1 + $0x78] sm:$0xff]  ;;  %v113_v50 = vld [vmem:[%s1037_s0 + $0xc0] sm:$0xff]  ;;  %v694_v10 = vsub.f32 %v102_v23, %v154_v41  ;;  %v726_v23 = vmul.f32 %v196_v44, %v196_v44  ;;  %v778_v44 = vmul.f32 %v198_v46, %v198_v46 }
   0xe   :  { %v111_v48 = vld [vmem:[%s1037_s0 + $0xb0] sm:$0xff]  ;;  %v112_v49 = vld [vmem:[%s1037_s0 + $0xb8] sm:$0xff]  ;;  %v157_v51 = vld [vmem:[%s1038_s1 + $0x80] sm:$0xff]  ;;  %v696_v11 = vsub.f32 %v103_v24, %v155_v42  ;;  %v698_v12 = vsub.f32 %v104_v25, %v156_v43 }
   0xf   :  { %v158_v52 = vld [vmem:[%s1038_s1 + $0x88] sm:$0xff]  ;;  %v159_v53 = vld [vmem:[%s1038_s1 + $0x90] sm:$0xff]  ;;  %v116_v60 = vld [vmem:[%s1037_s0 + $0xd8] sm:$0xff]  ;;  %v720_v20 = vsub.f32 %v105_v30, %v157_v51 }
  0x10   :  { %v114_v58 = vld [vmem:[%s1037_s0 + $0xc8] sm:$0xff]  ;;  %v115_v59 = vld [vmem:[%s1037_s0 + $0xd0] sm:$0xff]  ;;  %v160_v61 = vld [vmem:[%s1038_s1 + $0x98] sm:$0xff]  ;;  %v722_v21 = vsub.f32 %v106_v31, %v158_v52  ;;  %v724_v22 = vsub.f32 %v107_v32, %v159_v53 }
  0x11   :  { %v161_v62 = vld [vmem:[%s1038_s1 + $0xa0] sm:$0xff]  ;;  %v162_v63 = vld [vmem:[%s1038_s1 + $0xa8] sm:$0xff]  ;;  %v119_v6 = vld [vmem:[%s1037_s0 + $0xf0] sm:$0xff]  ;;  %v746_v30 = vsub.f32 %v108_v38, %v160_v61 }
  0x12   :  { %v117_v4 = vld [vmem:[%s1037_s0 + $0xe0] sm:$0xff]  ;;  %v118_v5 = vld [vmem:[%s1037_s0 + $0xe8] sm:$0xff]  ;;  %v163_v7 = vld [vmem:[%s1038_s1 + $0xb0] sm:$0xff]  ;;  %v748_v31 = vsub.f32 %v109_v39, %v161_v62  ;;  %v750_v32 = vsub.f32 %v110_v40, %v162_v63  ;;  %v806_v62 = vmul.f32 %v622_v47, %v622_v47 }
  0x13   :  { %v164_v8 = vld [vmem:[%s1038_s1 + $0xb8] sm:$0xff]  ;;  %v165_v9 = vld [vmem:[%s1038_s1 + $0xc0] sm:$0xff]  ;;  %v122_v16 = vld [vmem:[%s1037_s0 + $0x108] sm:$0xff]  ;;  %v772_v41 = vsub.f32 %v111_v48, %v163_v7 }
  0x14   :  { %v120_v14 = vld [vmem:[%s1037_s0 + $0xf8] sm:$0xff]  ;;  %v121_v15 = vld [vmem:[%s1037_s0 + $0x100] sm:$0xff]  ;;  %v166_v17 = vld [vmem:[%s1038_s1 + $0xc8] sm:$0xff]  ;;  %v774_v42 = vsub.f32 %v112_v49, %v164_v8  ;;  %v776_v43 = vsub.f32 %v113_v50, %v165_v9 }
  0x15   :  { %v167_v18 = vld [vmem:[%s1038_s1 + $0xd0] sm:$0xff]  ;;  %v168_v19 = vld [vmem:[%s1038_s1 + $0xd8] sm:$0xff]  ;;  %v125_v26 = vld [vmem:[%s1037_s0 + $0x120] sm:$0xff]  ;;  %v798_v50 = vsub.f32 %v114_v58, %v166_v17 }
  0x16   :  { %v123_v24 = vld [vmem:[%s1037_s0 + $0x110] sm:$0xff]  ;;  %v124_v25 = vld [vmem:[%s1037_s0 + $0x118] sm:$0xff]  ;;  %v169_v27 = vld [vmem:[%s1038_s1 + $0xe0] sm:$0xff]  ;;  %v800_v53 = vsub.f32 %v115_v59, %v167_v18  ;;  %v802_v61 = vsub.f32 %v116_v60, %v168_v19  ;;  %v252_v18 = vmul.f32 %v642_v54, %v642_v54 }
  0x17   :  { %v170_v28 = vld [vmem:[%s1038_s1 + $0xe8] sm:$0xff]  ;;  %v171_v29 = vld [vmem:[%s1038_s1 + $0xf0] sm:$0xff]  ;;  %v128_v36 = vld [vmem:[%s1037_s0 + $0x138] sm:$0xff]  ;;  %v826_v8 = vsub.f32 %v117_v4, %v169_v27 }
  0x18   :  { %v126_v34 = vld [vmem:[%s1037_s0 + $0x128] sm:$0xff]  ;;  %v127_v35 = vld [vmem:[%s1037_s0 + $0x130] sm:$0xff]  ;;  %v172_v38 = vld [vmem:[%s1038_s1 + $0xf8] sm:$0xff]  ;;  %v828_v9 = vsub.f32 %v118_v5, %v170_v28  ;;  %v830_v17 = vsub.f32 %v119_v6, %v171_v29 }
  0x19   :  { %v173_v39 = vld [vmem:[%s1038_s1 + $0x100] sm:$0xff]  ;;  %v174_v40 = vld [vmem:[%s1038_s1 + $0x108] sm:$0xff]  ;;  %v131_v52 = vld [vmem:[%s1037_s0 + $0x150] sm:$0xff]  ;;  %1042 = vst [vmem:[#allocation4_spill] sm:$0xff] %v826_v8  ;;  %v852_v27 = vsub.f32 %v120_v14, %v172_v38 }
  0x1a   :  { %v129_v45 = vld [vmem:[%s1037_s0 + $0x140] sm:$0xff]  ;;  %v130_v51 = vld [vmem:[%s1037_s0 + $0x148] sm:$0xff]  ;;  %v175_v48 = vld [vmem:[%s1038_s1 + $0x110] sm:$0xff]  ;;  %1043 = vst [vmem:[#allocation5_spill] sm:$0xff] %v828_v9  ;;  %v854_v28 = vsub.f32 %v121_v15, %v173_v39  ;;  %v856_v29 = vsub.f32 %v122_v16, %v174_v40 }
  0x1b   :  { %v176_v46 = vld [vmem:[%s1038_s1 + $0x118] sm:$0xff]  ;;  %v177_v49 = vld [vmem:[%s1038_s1 + $0x120] sm:$0xff]  ;;  %v134_v58 = vld [vmem:[%s1037_s0 + $0x168] sm:$0xff]  ;;  %1044 = vst [vmem:[#allocation6_spill] sm:$0xff] %v830_v17  ;;  %v253_v17 = vmul.f32 %v644_v55, %v644_v55  ;;  %v878_v38 = vsub.f32 %v123_v24, %v175_v48 }
  0x1c   :  { %v132_v63 = vld [vmem:[%s1037_s0 + $0x158] sm:$0xff]  ;;  %v133_v7 = vld [vmem:[%s1037_s0 + $0x160] sm:$0xff]  ;;  %v178_v59 = vld [vmem:[%s1038_s1 + $0x128] sm:$0xff]  ;;  %1045 = vst [vmem:[#allocation7_spill] sm:$0xff] %v852_v27  ;;  %v880_v39 = vsub.f32 %v124_v25, %v176_v46  ;;  %v882_v40 = vsub.f32 %v125_v26, %v177_v49 }
  0x1d   :  { %v179_v47 = vld [vmem:[%s1038_s1 + $0x130] sm:$0xff]  ;;  %v180_v60 = vld [vmem:[%s1038_s1 + $0x138] sm:$0xff]  ;;  %v137_v4 = vld [vmem:[%s1037_s0 + $0x180] sm:$0xff]  ;;  %1046 = vst [vmem:[#allocation8_spill] sm:$0xff] %v854_v28  ;;  %v895_v48 = vsub.f32 %v126_v34, %v178_v59 }
  0x1e   :  { %v135_v19 = vld [vmem:[%s1037_s0 + $0x170] sm:$0xff]  ;;  %v136_v37 = vld [vmem:[%s1037_s0 + $0x178] sm:$0xff]  ;;  %v181_v5 = vld [vmem:[%s1038_s1 + $0x140] sm:$0xff]  ;;  %1047 = vst [vmem:[#allocation9_spill] sm:$0xff] %v856_v29  ;;  %v254_v29 = vmul.f32 %v646_v56, %v646_v56  ;;  %v897_v25 = vsub.f32 %v127_v35, %v179_v47  ;;  %v899_v26 = vsub.f32 %v128_v36, %v180_v60  ;;  %v255_v56 = vmul.f32 %v668_v0, %v668_v0 }
  0x1f   :  { %v182_v54 = vld [vmem:[%s1038_s1 + $0x148] sm:$0xff]  ;;  %v183_v6 = vld [vmem:[%s1038_s1 + $0x150] sm:$0xff]  ;;  %v140_v14 = vld [vmem:[%s1037_s0 + $0x198] sm:$0xff]  ;;  %1048 = vst [vmem:[#allocation10_spill] sm:$0xff] %v895_v48  ;;  %v912_v59 = vsub.f32 %v129_v45, %v181_v5  ;;  %v256_v0 = vmul.f32 %v670_v1, %v670_v1 }
  0x20   :  { %v138_v9 = vld [vmem:[%s1037_s0 + $0x188] sm:$0xff]  ;;  %v139_v8 = vld [vmem:[%s1037_s0 + $0x190] sm:$0xff]  ;;  %v184_v15 = vld [vmem:[%s1038_s1 + $0x158] sm:$0xff]  ;;  %1049 = vst [vmem:[#allocation11_spill] sm:$0xff] %v897_v25  ;;  %v914_v35 = vsub.f32 %v130_v51, %v182_v54  ;;  %v916_v36 = vsub.f32 %v131_v52, %v183_v6  ;;  %v257_v25 = vmul.f32 %v672_v2, %v672_v2  ;;  %v258_v52 = vmul.f32 %v694_v10, %v694_v10 }
  0x21   :  { %v185_v55 = vld [vmem:[%s1038_s1 + $0x160] sm:$0xff]  ;;  %v186_v16 = vld [vmem:[%s1038_s1 + $0x168] sm:$0xff]  ;;  %v187_v28 = vld [vmem:[%s1038_s1 + $0x170] sm:$0xff]  ;;  %1050 = vst [vmem:[#allocation12_spill] sm:$0xff] %v899_v26  ;;  %v920_v47 = vsub.f32 %v132_v63, %v184_v15  ;;  %v260_v2 = vmul.f32 %v698_v12, %v698_v12  ;;  %v396_v10 = vadd.f32 %v752_v33, %v648_v57  ;;  %v432_v12 = vadd.f32 %v252_v18, %v726_v23 }
  0x22   :  { %v188_v27 = vld [vmem:[%s1038_s1 + $0x178] sm:$0xff]  ;;  %v189_v24 = vld [vmem:[%s1038_s1 + $0x180] sm:$0xff]  ;;  %v190_v46 = vld [vmem:[%s1038_s1 + $0x188] sm:$0xff]  ;;  %v922_v60 = vsub.f32 %v133_v7, %v185_v55  ;;  %v924_v26 = vsub.f32 %v134_v58, %v186_v16  ;;  %v928_v48 = vsub.f32 %v135_v19, %v187_v28  ;;  %v259_v7 = vmul.f32 %v696_v11, %v696_v11 }
  0x23   :  { %v191_v49 = vld [vmem:[%s1038_s1 + $0x190] sm:$0xff]  ;;  %v192_v34 = vld [vmem:[%s1038_s1 + $0x198] sm:$0xff]  ;;  %v930_v45 = vsub.f32 %v136_v37, %v188_v27  ;;  %v932_v51 = vsub.f32 %v137_v4, %v189_v24  ;;  %v936_v5 = vsub.f32 %v138_v9, %v190_v46  ;;  %v261_v37 = vmul.f32 %v720_v20, %v720_v20  ;;  %v1051_v4 = vld [vmem:[#allocation4_spill] sm:$0xff] }
  0x24   :  { %v938_v1 = vsub.f32 %v139_v8, %v191_v49  ;;  %v940_v63 = vsub.f32 %v140_v14, %v192_v34  ;;  %v262_v58 = vmul.f32 %v722_v21, %v722_v21  ;;  %v263_v8 = vmul.f32 %v724_v22, %v724_v22  ;;  %v1053_v27 = vld [vmem:[#allocation6_spill] sm:$0xff]  ;;  %v1055_v55 = vld [vmem:[#allocation8_spill] sm:$0xff] }
  0x25   :  { %v408_v9 = vadd.f32 %v778_v44, %v674_v3  ;;  %v420_v11 = vadd.f32 %v806_v62, %v700_v13  ;;  %v264_v20 = vmul.f32 %v746_v30, %v746_v30  ;;  %v265_v21 = vmul.f32 %v748_v31, %v748_v31 }
  0x26   :  { %v266_v57 = vmul.f32 %v750_v32, %v750_v32  ;;  %v397_v33 = vadd.f32 %v396_v10, %v253_v17  ;;  %v267_v22 = vmul.f32 %v772_v41, %v772_v41  ;;  %v433_v44 = vadd.f32 %v432_v12, %v256_v0 }
  0x27   :  { %v409_v19 = vadd.f32 %v408_v9, %v254_v29  ;;  %v421_v3 = vadd.f32 %v420_v11, %v255_v56  ;;  %v268_v13 = vmul.f32 %v774_v42, %v774_v42  ;;  %v269_v23 = vmul.f32 %v776_v43, %v776_v43  ;;  %v1052_v42 = vld [vmem:[#allocation5_spill] sm:$0xff]  ;;  %v1059_v10 = vld [vmem:[#allocation11_spill] sm:$0xff] }
  0x28   :  { %v270_v30 = vmul.f32 %v798_v50, %v798_v50  ;;  %v398_v31 = vadd.f32 %v397_v33, %v257_v25  ;;  %v271_v32 = vmul.f32 %v800_v53, %v800_v53  ;;  %v434_v18 = vadd.f32 %v433_v44, %v260_v2  ;;  %v1054_v53 = vld [vmem:[#allocation7_spill] sm:$0xff]  ;;  %v1058_v2 = vld [vmem:[#allocation10_spill] sm:$0xff] }
  0x29   :  { %v410_v62 = vadd.f32 %v409_v19, %v258_v52  ;;  %v422_v17 = vadd.f32 %v421_v3, %v259_v7  ;;  %v272_v41 = vmul.f32 %v802_v61, %v802_v61  ;;  %v273_v54 = vmul.f32 %v1051_v4, %v1051_v4  ;;  %v1056_v61 = vld [vmem:[#allocation9_spill] sm:$0xff]  ;;  %v1057_v25 = vld [vmem:[#allocation3_spill] sm:$0xff] }
  0x2a   :  { %v274_v6 = vmul.f32 %v1052_v42, %v1052_v42  ;;  %v399_v43 = vadd.f32 %v398_v31, %v261_v37  ;;  %v275_v50 = vmul.f32 %v1053_v27, %v1053_v27  ;;  %v435_v14 = vadd.f32 %v434_v18, %v264_v20 }
  0x2b   :  { %v411_v28 = vadd.f32 %v410_v62, %v262_v58  ;;  %v423_v29 = vadd.f32 %v422_v17, %v263_v8  ;;  %v276_v15 = vmul.f32 %v1054_v53, %v1054_v53  ;;  %v277_v16 = vmul.f32 %v1055_v55, %v1055_v55 }
  0x2c   :  { %v278_v24 = vmul.f32 %v1056_v61, %v1056_v61  ;;  %vm339_vm0 = vcmp.lt.s32.totalorder %v1057_v25, 100  ;;  %v400_v56 = vadd.f32 %v399_v43, %v265_v21  ;;  %v279_v46 = vmul.f32 %v878_v38, %v878_v38  ;;  %v1060_v38 = vld [vmem:[#allocation12_spill] sm:$0xff] }
  0x2d   :  { %v412_v49 = vadd.f32 %v411_v28, %v266_v57  ;;  %v424_v34 = vadd.f32 %v423_v29, %v267_v22  ;;  %v436_v0 = vadd.f32 %v435_v14, %v268_v13  ;;  %v280_v52 = vmul.f32 %v880_v39, %v880_v39 }
  0x2e   :  { %v281_v7 = vmul.f32 %v882_v40, %v882_v40  ;;  %v282_v37 = vmul.f32 %v1058_v2, %v1058_v2  ;;  %v401_v58 = vadd.f32 %v400_v56, %v269_v23  ;;  %v283_v8 = vmul.f32 %v1059_v10, %v1059_v10 }
  0x2f   :  { %v413_v9 = vadd.f32 %v412_v49, %v270_v30  ;;  %v425_v11 = vadd.f32 %v424_v34, %v271_v32  ;;  %v437_v12 = vadd.f32 %v436_v0, %v272_v41  ;;  %v284_v20 = vmul.f32 %v1060_v38, %v1060_v38 }
  0x30   :  { %v285_v21 = vmul.f32 %v912_v59, %v912_v59  ;;  %v286_v39 = vmul.f32 %v914_v35, %v914_v35  ;;  %v402_v40 = vadd.f32 %v401_v58, %v273_v54  ;;  %v287_v57 = vmul.f32 %v916_v36, %v916_v36 }
  0x31   :  { %v414_v33 = vadd.f32 %v413_v9, %v274_v6  ;;  %v426_v22 = vadd.f32 %v425_v11, %v275_v50  ;;  %v438_v19 = vadd.f32 %v437_v12, %v276_v15  ;;  %v288_v3 = vmul.f32 %v920_v47, %v920_v47 }
  0x32   :  { %v289_v44 = vmul.f32 %v922_v60, %v922_v60  ;;  %v290_v13 = vmul.f32 %v924_v26, %v924_v26  ;;  %v403_v59 = vadd.f32 %v402_v40, %v277_v16  ;;  %v293_v35 = vmul.f32 %v932_v51, %v932_v51 }
  0x33   :  { %v415_v23 = vadd.f32 %v414_v33, %v278_v24  ;;  %v427_v30 = vadd.f32 %v426_v22, %v279_v46  ;;  %v439_v31 = vadd.f32 %v438_v19, %v280_v52  ;;  %v291_v36 = vmul.f32 %v928_v48, %v928_v48 }
  0x34   :  { %v294_v32 = vmul.f32 %v936_v5, %v936_v5  ;;  %v295_v47 = vmul.f32 %v938_v1, %v938_v1  ;;  %v404_v60 = vadd.f32 %v403_v59, %v281_v7  ;;  %v292_v26 = vmul.f32 %v930_v45, %v930_v45 }
  0x35   :  { %v416_v62 = vadd.f32 %v415_v23, %v282_v37  ;;  %v428_v17 = vadd.f32 %v427_v30, %v283_v8  ;;  %v440_v18 = vadd.f32 %v439_v31, %v284_v20  ;;  %v296_v51 = vmul.f32 %v940_v63, %v940_v63 }
  0x36   :  { %v405_v41 = vadd.f32 %v404_v60, %v285_v21  ;;  %v388_v48 = vsel %vm339_vm0, %v293_v35, 0.0  ;;  %v389_v1 = vsel %vm339_vm0, %v294_v32, 0.0  ;;  %v390_v42 = vsel %vm339_vm0, %v295_v47, 0.0 }
  0x37   :  { %v417_v4 = vadd.f32 %v416_v62, %v286_v39  ;;  %v429_v54 = vadd.f32 %v428_v17, %v287_v57  ;;  %v441_v5 = vadd.f32 %v440_v18, %v288_v3  ;;  %v391_v63 = vsel %vm339_vm0, %v296_v51, 0.0 }
  0x38   :  { %v406_v45 = vadd.f32 %v405_v41, %v289_v44 }
  0x39   :  { %v418_v6 = vadd.f32 %v417_v4, %v290_v13  ;;  %v430_v43 = vadd.f32 %v429_v54, %v291_v36  ;;  %v442_v27 = vadd.f32 %v441_v5, %v292_v26 }
  0x3a   :  { %v407_v50 = vadd.f32 %v406_v45, %v388_v48 }
  0x3b   :  { %v419_v28 = vadd.f32 %v418_v6, %v389_v1  ;;  %v431_v29 = vadd.f32 %v430_v43, %v390_v42  ;;  %v443_v14 = vadd.f32 %v442_v27, %v391_v63 }
  0x3d   :  { %v459_v53 = vadd.f32 %v419_v28, %v407_v50 }
  0x3f   :  { %v460_v15 = vadd.f32 %v459_v53, %v431_v29 }
  0x41   :  { %v461_v55 = vadd.f32 %v460_v15, %v443_v14 }
  0x43   :  { %462 = vadd.xlane.f32.xlu0 %v461_v55 }
  0xd0   :  { %v463_v16 = vpop.xlane.xlu0 %462 }
  0xd1   :  { %v464_v61 = vrot.slane %v463_v16, 4 }
  0xd3   :  { %v465_v24 = vadd.f32 %v464_v61, %v463_v16 }
  0xd5   :  { %v466_v56 = vrot.slane %v465_v24, 2 }
  0xd7   :  { %v467_v46 = vadd.f32 %v466_v56, %v465_v24 }
  0xd9   :  { %v468_v49 = vrot.slane %v467_v46, 1 }
  0xdb   :  { %v469_v34 = vadd.f32 %v468_v49, %v467_v46 }
  0xdd   :  { %489 = vpush %v469_v34 }
 0x10e   :  { %s490_s1 = spop %489 }
 0x10f   :  { %v471_v0 = vstv %s490_s1 }
 0x110   :  { %472 = vst [vmem:[%s1039_s2] sm:$0xff] %v471_v0 }

</bundles_post_ra>
